<compile_context>
chip_gen: v6e
topology: v6e:2x2x1
jax: 0.10.0
libtpu: 0.0.40
codegen_flags: <defaults>
</compile_context>

<pallas_src>
import functools

import jax
import jax.numpy as jnp
from jax.experimental import pallas as pl
from jax.experimental.pallas import tpu as pltpu


def resnet_top_kernel(x_ref, w_ref, b_ref, o_ref):
    # x_ref: (TB, C, HW) -- NCHW with spatial flattened; HW on the lane axis.
    # w_ref: (C, NC)     -- classifier weight, pre-transposed, pre-scaled 1/(H*W).
    # b_ref: (1, NC)     -- bias (f32).
    # o_ref: (TB, NC)
    #
    # AdaptiveAvgPool2d((1,1)) + flatten(1): mean over spatial.  The 1/(H*W)
    # scale is folded into w, so the pool is a plain lane-axis sum accumulated
    # in f32 regardless of input dtype.
    pooled = jnp.sum(x_ref[...].astype(jnp.float32), axis=-1)          # (TB, C)
    # nn.Linear: pooled @ W^T + b.  Cast pooled to the weight dtype so bf16
    # weights run the MXU at native rate; accumulate in f32.
    y = jnp.dot(pooled.astype(w_ref.dtype), w_ref[...],
                preferred_element_type=jnp.float32)                    # (TB, NC)
    o_ref[...] = (y + b_ref[...]).astype(o_ref.dtype)


def _round_up(a, b):
    return pl.cdiv(a, b) * b


def _vmem_limit_bytes():
    """Scoped-VMEM limit per generation (v5e/v6e: 128 MiB physical, v7x: 64 MiB
    per TensorCore).  Unknown hardware -> the conservative (v7x) value."""
    try:
        cap = int(getattr(pltpu.get_tpu_info(), "vmem_capacity_bytes", 0))
    except Exception:
        cap = 0
    if cap >= 100 * 1024 * 1024:
        return 96 * 1024 * 1024
    return 48 * 1024 * 1024


def _pick_batch_tile(B, C, HW, NC, x_itemsize, w_itemsize, out_itemsize,
                     vmem_limit, resident_buffers):
    """Largest batch tile whose double-buffered x/out blocks plus the resident
    weight/bias fit the scoped-VMEM budget, keeping >= 2 grid steps whenever
    the batch allows (v7x megacore + pipeline ramp)."""
    sub_x = max(8, 32 // x_itemsize)      # sublane packing of the x tile
    sub_o = max(8, 32 // out_itemsize)    # sublane packing of the output tile
    sub_w = max(8, 32 // w_itemsize)
    c_pad = _round_up(C, sub_x)
    hw_pad = _round_up(HW, 128)           # lane padding of the x tile
    nc_pad = _round_up(NC, 128)           # lane padding of weight / output

    resident = (resident_buffers * _round_up(C, sub_w) * nc_pad * w_itemsize
                + resident_buffers * 8 * nc_pad * 4)            # weight + bias
    budget = vmem_limit - resident - 4 * 1024 * 1024            # margin
    per_row = (2 * c_pad * hw_pad * x_itemsize                  # dbl-buffered x
               + 2 * nc_pad * out_itemsize)                     # dbl-buffered out
    tb = max(1, budget // per_row)
    tb = min(tb, 512)
    if B >= 2 * sub_o:
        # Cap so there are always >= 2 grid steps to shard across TensorCores.
        tb = min(tb, _round_up(pl.cdiv(B, 2), sub_o))
    if tb >= B:
        return B                                    # single full-batch block
    tb = max(sub_o, (tb // sub_o) * sub_o)          # unmasked (tb, NC) stores
    return min(int(tb), B)


@functools.partial(jax.jit, static_argnames=("tb", "single_buffer_resident"))
def _forward(x_nchw, weight, bias, tb, single_buffer_resident):
    B, C, H, W = x_nchw.shape
    NC = weight.shape[0]
    HW = H * W

    # Free reshape (merges contiguous trailing dims) -- no HBM relayout of x.
    x3 = x_nchw.reshape(B, C, HW)

    # Fold the 1/(H*W) pooling scale into the pre-transposed classifier weight.
    w_dtype = jnp.bfloat16 if x_nchw.dtype == jnp.bfloat16 else jnp.float32
    w_t = (weight.astype(jnp.float32).T * (1.0 / float(HW))).astype(w_dtype)
    b2 = bias.astype(jnp.float32).reshape(1, NC)

    x_item = jnp.dtype(x_nchw.dtype).itemsize
    w_item = jnp.dtype(w_dtype).itemsize
    out_item = x_item
    vmem_limit = _vmem_limit_bytes()

    if tb is None:
        tb = _pick_batch_tile(B, C, HW, NC, x_item, w_item, out_item,
                              vmem_limit,
                              resident_buffers=1 if single_buffer_resident else 2)

    cost = pl.CostEstimate(
        flops=2 * B * C * NC + B * C * HW,
        transcendentals=0,
        bytes_accessed=(B * C * HW * x_item            # x stream (dominant)
                        + C * NC * w_item + NC * 4     # resident weight + bias
                        + B * NC * out_item),          # output
    )

    resident_kwargs = (dict(pipeline_mode=pl.Buffered(1))
                       if single_buffer_resident else {})

    # TODO(synk): on v7x, if the profile still shows exposed DMA after tile
    # enlargement, try pipeline_mode=pl.Buffered(3) on the x spec.
    return pl.pallas_call(
        resnet_top_kernel,
        out_shape=jax.ShapeDtypeStruct((B, NC), x_nchw.dtype),
        grid=(pl.cdiv(B, tb),),
        in_specs=[
            # Streamed x tile; NCHW consumed directly (no HBM relayout).
            pl.BlockSpec((tb, C, HW), lambda i: (i, 0, 0)),
            # Resident weight / bias: constant index_map, fetched once.
            pl.BlockSpec((C, NC), lambda i: (0, 0), **resident_kwargs),
            pl.BlockSpec((1, NC), lambda i: (0, 0), **resident_kwargs),
        ],
        out_specs=pl.BlockSpec((tb, NC), lambda i: (i, 0)),
        compiler_params=pltpu.CompilerParams(
            # Independent batch tiles -> shard across both TCs on v7x.
            dimension_semantics=("parallel",),
            vmem_limit_bytes=vmem_limit,
        ),
        cost_estimate=cost,
    )(x3, w_t, b2)


def resnet_top(x_nchw, weight, bias, tb=None):
    """ResnetTop forward: AdaptiveAvgPool2d((1,1)) -> flatten(1) -> Linear.

    x_nchw: (B, C, H, W).  weight: (NC, C).  bias: (NC,).
    """
    try:
        # Preferred path: single-buffered resident weight/bias.
        return _forward(x_nchw, weight, bias, tb=tb, single_buffer_resident=True)
    except Exception:
        # Fallback for runtimes without pipeline_mode / Buffered(1) support.
        return _forward(x_nchw, weight, bias, tb=tb, single_buffer_resident=False)


if __name__ == "__main__":
    # Small shapes consistent with the module: NCHW input, linear head.
    B, C, H, W = 2, 4, 16, 16
    NUM_CLASSES = 8

    key = jax.random.PRNGKey(0)
    kx, kw, kb = jax.random.split(key, 3)
    x = jax.random.normal(kx, (B, C, H, W), dtype=jnp.float32)
    weight = jax.random.normal(kw, (NUM_CLASSES, C), dtype=jnp.float32) * 0.1
    bias = jax.random.normal(kb, (NUM_CLASSES,), dtype=jnp.float32) * 0.1

    out = resnet_top(x, weight, bias)
    out = jax.block_until_ready(out)

    # Pure-JAX reference (AdaptiveAvgPool2d((1,1)) -> flatten -> Linear)
    ref = jnp.mean(x, axis=(2, 3)) @ weight.T + bias
    assert out.shape == (B, NUM_CLASSES)
    assert jnp.allclose(out, ref, atol=1e-5, rtol=1e-5), "mismatch vs reference"

    print("KERNEL_OK")
</pallas_src>

<mosaic_0001>
module attributes {stable_mosaic.version = 11 : i64} {
  func.func @resnet_top_kernel(%arg0: i32, %arg1: memref<2x4x256xf32, #tpu.memory_space<vmem>>, %arg2: memref<4x8xf32, #tpu.memory_space<vmem>>, %arg3: memref<1x8xf32, #tpu.memory_space<vmem>>, %arg4: memref<2x8xf32, #tpu.memory_space<vmem>>) attributes {dimension_semantics = [#tpu.dimension_semantics<parallel>], iteration_bounds = array<i64: 1>, scalar_prefetch = 0 : i64, scratch_operands = 0 : i64, tpu.core_type = #tpu.core_type<tc>, window_params = [{transform_indices = @transform_0, window_bounds = array<i64: 2, 4, 256>}, {pipeline_mode = #tpu.pipeline_mode<synchronous>, transform_indices = @transform_1, window_bounds = array<i64: 4, 8>}, {pipeline_mode = #tpu.pipeline_mode<synchronous>, transform_indices = @transform_2, window_bounds = array<i64: 1, 8>}, {transform_indices = @transform_3, window_bounds = array<i64: 2, 8>}]} {
    %c0 = arith.constant 0 : index
    %c0_0 = arith.constant 0 : index
    %c0_1 = arith.constant 0 : index
    %0 = vector.load %arg1[%c0, %c0_0, %c0_1] : memref<2x4x256xf32, #tpu.memory_space<vmem>>, vector<2x4x256xf32>
    %cst = arith.constant dense<0.000000e+00> : vector<2x4xf32>
    %1 = vector.multi_reduction <add>, %0, %cst [2] : vector<2x4x256xf32> to vector<2x4xf32>
    %c0_2 = arith.constant 0 : index
    %c0_3 = arith.constant 0 : index
    %2 = vector.load %arg2[%c0_2, %c0_3] : memref<4x8xf32, #tpu.memory_space<vmem>>, vector<4x8xf32>
    %cst_4 = arith.constant dense<0.000000e+00> : vector<2x8xf32>
    %3 = tpu.matmul %1, %2, %cst_4 {dimension_numbers = #tpu.dot_dimension_numbers<[1], [0], [0], [1], [0, 0, 1, 1], [], []>} : vector<2x4xf32>, vector<4x8xf32>, vector<2x8xf32> -> vector<2x8xf32>
    %c0_5 = arith.constant 0 : index
    %c0_6 = arith.constant 0 : index
    %4 = vector.load %arg3[%c0_5, %c0_6] : memref<1x8xf32, #tpu.memory_space<vmem>>, vector<1x8xf32>
    %5 = vector.broadcast %4 : vector<1x8xf32> to vector<2x8xf32>
    %6 = arith.addf %3, %5 : vector<2x8xf32>
    %c0_7 = arith.constant 0 : index
    %c0_8 = arith.constant 0 : index
    %7 = vector.load %arg4[%c0_7, %c0_8] : memref<2x8xf32, #tpu.memory_space<vmem>>, vector<2x8xf32>
    tpu.vector_store %arg4[%c0_7, %c0_8], %6 {strides = array<i32>} : memref<2x8xf32, #tpu.memory_space<vmem>>, vector<2x8xf32>,
    return
  }
  func.func @transform_0(%arg0: i32) -> (i32, i32, i32) {
    %c0_i32 = arith.constant 0 : i32
    %c0_i32_0 = arith.constant 0 : i32
    %c0_i32_1 = arith.constant 0 : i32
    return %arg0, %c0_i32, %c0_i32_0 : i32, i32, i32
  }
  func.func @transform_1(%arg0: i32) -> (i32, i32) {
    %c0_i32 = arith.constant 0 : i32
    %c0_i32_0 = arith.constant 0 : i32
    %c0_i32_1 = arith.constant 0 : i32
    return %c0_i32, %c0_i32_0 : i32, i32
  }
  func.func @transform_2(%arg0: i32) -> (i32, i32) {
    %c0_i32 = arith.constant 0 : i32
    %c0_i32_0 = arith.constant 0 : i32
    %c0_i32_1 = arith.constant 0 : i32
    return %c0_i32, %c0_i32_0 : i32, i32
  }
  func.func @transform_3(%arg0: i32) -> (i32, i32) {
    %c0_i32 = arith.constant 0 : i32
    %c0_i32_0 = arith.constant 0 : i32
    return %arg0, %c0_i32 : i32, i32
  }
}

module attributes {stable_mosaic.version = 11 : i64} {
  func.func @resnet_top_kernel(%arg0: i32, %arg1: memref<2x4x256xf32, #tpu.memory_space<vmem>>, %arg2: memref<4x8xf32, #tpu.memory_space<vmem>>, %arg3: memref<1x8xf32, #tpu.memory_space<vmem>>, %arg4: memref<2x8xf32, #tpu.memory_space<vmem>>) attributes {dimension_semantics = [#tpu.dimension_semantics<parallel>], iteration_bounds = array<i64: 1>, scalar_prefetch = 0 : i64, scratch_operands = 0 : i64, tpu.core_type = #tpu.core_type<tc>, window_params = [{transform_indices = @transform_0, window_bounds = array<i64: 2, 4, 256>}, {pipeline_mode = #tpu.pipeline_mode<synchronous>, transform_indices = @transform_1, window_bounds = array<i64: 4, 8>}, {pipeline_mode = #tpu.pipeline_mode<synchronous>, transform_indices = @transform_2, window_bounds = array<i64: 1, 8>}, {transform_indices = @transform_3, window_bounds = array<i64: 2, 8>}]} {
    %c0 = arith.constant 0 : index
    %c0_0 = arith.constant 0 : index
    %c0_1 = arith.constant 0 : index
    %0 = vector.load %arg1[%c0, %c0_0, %c0_1] : memref<2x4x256xf32, #tpu.memory_space<vmem>>, vector<2x4x256xf32>
    %cst = arith.constant dense<0.000000e+00> : vector<2x4xf32>
    %1 = vector.multi_reduction <add>, %0, %cst [2] : vector<2x4x256xf32> to vector<2x4xf32>
    %c0_2 = arith.constant 0 : index
    %c0_3 = arith.constant 0 : index
    %2 = vector.load %arg2[%c0_2, %c0_3] : memref<4x8xf32, #tpu.memory_space<vmem>>, vector<4x8xf32>
    %cst_4 = arith.constant dense<0.000000e+00> : vector<2x8xf32>
    %3 = tpu.matmul %1, %2, %cst_4 {dimension_numbers = #tpu.dot_dimension_numbers<[1], [0], [0], [1], [0, 0, 1, 1], [], []>} : vector<2x4xf32>, vector<4x8xf32>, vector<2x8xf32> -> vector<2x8xf32>
    %c0_5 = arith.constant 0 : index
    %c0_6 = arith.constant 0 : index
    %4 = vector.load %arg3[%c0_5, %c0_6] : memref<1x8xf32, #tpu.memory_space<vmem>>, vector<1x8xf32>
    %5 = vector.broadcast %4 : vector<1x8xf32> to vector<2x8xf32>
    %6 = arith.addf %3, %5 : vector<2x8xf32>
    %c0_7 = arith.constant 0 : index
    %c0_8 = arith.constant 0 : index
    %7 = vector.load %arg4[%c0_7, %c0_8] : memref<2x8xf32, #tpu.memory_space<vmem>>, vector<2x8xf32>
    tpu.vector_store %arg4[%c0_7, %c0_8], %6 {strides = array<i32>} : memref<2x8xf32, #tpu.memory_space<vmem>>, vector<2x8xf32>,
    return
  }
  func.func @transform_0(%arg0: i32) -> (i32, i32, i32) {
    %c0_i32 = arith.constant 0 : i32
    %c0_i32_0 = arith.constant 0 : i32
    %c0_i32_1 = arith.constant 0 : i32
    return %arg0, %c0_i32, %c0_i32_0 : i32, i32, i32
  }
  func.func @transform_1(%arg0: i32) -> (i32, i32) {
    %c0_i32 = arith.constant 0 : i32
    %c0_i32_0 = arith.constant 0 : i32
    %c0_i32_1 = arith.constant 0 : i32
    return %c0_i32, %c0_i32_0 : i32, i32
  }
  func.func @transform_2(%arg0: i32) -> (i32, i32) {
    %c0_i32 = arith.constant 0 : i32
    %c0_i32_0 = arith.constant 0 : i32
    %c0_i32_1 = arith.constant 0 : i32
    return %c0_i32, %c0_i32_0 : i32, i32
  }
  func.func @transform_3(%arg0: i32) -> (i32, i32) {
    %c0_i32 = arith.constant 0 : i32
    %c0_i32_0 = arith.constant 0 : i32
    return %arg0, %c0_i32 : i32, i32
  }
}

</mosaic_0001>

<bundles_post_ra>
// kernel: _forward.1
= control target key start
LH: loop header
LB: loop body
LE: loop exit
PB: predicated region body
PF: predicated region fallthrough
CT: control target
= control target key end

     0   :  { %vm23_vm0 = vcmask 1043456   ;;  %s228_s0 = inlined_call_operand.vmem [shape: f32[2,4,256], index: 0, kind: input, shape index: {}]   ;;  %s229_s1 = inlined_call_operand.vmem [shape: f32[4,8], index: 1, kind: input, shape index: {}]   ;;  %s230_s2 = inlined_call_operand.vmem [shape: f32[1,8], index: 2, kind: input, shape index: {}]   ;;  %s231_s3 = inlined_call_operand.hbm [shape: f32[2,8], index: 3, kind: output, shape index: {}]  }
   0x1   :  { %v15_v0 = vld [vmem:[%s228_s0] sm:$0xff]  ;;  %v16_v1 = vld [vmem:[%s228_s0 + $0x8] sm:$0xff] }
   0x2   :  { %8 = vsyncpa [#allocation3], 0  ;;  %v19_v2 = vcombine.high %v15_v0, %v15_v0  ;;  %v24_v3 = vsel %vm23_vm0, %v15_v0, 0.0  ;;  %v20_v4 = vcombine.high %v16_v1, %v16_v1  ;;  %v29_v6 = vsel %vm23_vm0, %v16_v1, 0.0  ;;  %v34_v10 = vld [vmem:[%s229_s1] sm:$0xf] }
   0x3   :  { %v185_v11 = vmov 0.0   ;;  %vm186_vm1 = vmmov 0   ;;  %v44_v12 = vlaneseq  ;;  %vm54_vm2 = vcmask 1041409   ;;  %v148_v21 = vld [vmem:[%s230_s2] ss:$0 sm:$0xff]  ;;  %s187_s18 = smov [#allocation2]  }
   0x4   :  { %v25_v5 = vsel %vm23_vm0, %v19_v2, 0.0  ;;  %v30_v7 = vsel %vm23_vm0, %v20_v4, 0.0  ;;  %153 = vmatprep.subr.mxu0 %v185_v11  ;;  %155 = vmatprep.mubr.msk.f32.mxu0 %vm186_vm1, %v185_v11  ;;  %vm56_vm3 = vcmask 31744   ;;  %s140_s19 = sshll.u32 %s187_s18, 4  ;;  %vm132_vm4 = vcmask 58368   ;;  %s141_s19 = int_to_ptr.vmem [resolvable:$true] %s140_s19 }
   0x5   :  { %v26_v8 = vadd.f32 %v25_v5, %v24_v3  ;;  %v31_v9 = vadd.f32 %v30_v7, %v29_v6  ;;  %154 = vmatpush3.msk.msra.mxu0 %vm23_vm0, %v34_v10  ;;  %v45_v13 = vand.u32 127, %v44_v12  ;;  %v47_v14 = vshrl.u32 %v44_v12, 7  ;;  %s163_s20 = scalar_lea.vmem %s141_s19, 32  ;;  %p168_p1 = scmp.lt.s32.totalorder %s141_s19, %s141_s19 }
   0x6   :  { %p164_p0 = scmp.ne.s32.totalorder %s141_s19, %s163_s20  ;;  %p169_p2 = scmp.lt.s32.totalorder %s163_s20, %s163_s20 }
   0x7   :  { %27 = vadd.xlane.f32.xlu0 %v26_v8  ;;  %v48_v16 = vsub.s32 %v45_v13, %v47_v14 }
   0x8   :  { %p170_p3 = por %p169_p2, %p168_p1 }
   0xa   :  { %p171_p4 = pnand %p170_p3, %p164_p0 }
   0xb   :  { %32 = vadd.xlane.f32.xlu0 %v31_v9 }
  0x90   :  { %v28_v15 = vpop.xlane.xlu0 %27 }
  0x91   :  { %v49_v18 = vrot.slane %v28_v15, %v48_v16 }
  0x94   :  { %v33_v17 = vpop.xlane.xlu0 %32 }
  0x95   :  { %v53_v19 = vrot.slane %v33_v17, %v48_v16 }
  0x97   :  { %v55_v20 = vsel %vm54_vm2, %v53_v19, %v49_v18 }
  0x98   :  { %156 = vmatmul.mubr.msk.f32.vlgmr.msra.gmra.mxu0 %vm56_vm3, %v55_v20 }
 0x158   :  { %v128_v22 = vpop.f32.mrf.mxu0 }
 0x159   :  { %v129_v23 = vadd.f32 %v148_v21, %v128_v22 }
 0x15a   :  { %v157_v24 = vpop.f32.mrf.mxu0 }
 0x15b   :  { %133 = vst.msk [vmem:[#allocation2] sm:$0x3] %vm132_vm4, %v129_v23 }
 0x15c   :  { %174 = shalt.err (!%p171_p4)
}
 0x15d   :  { %143 = dma.vmem_to_hbm [thread:$0]  %s141_s19, 32, %s231_s3, [#allocation3]  }
 0x15e   :  { %183 = dma.done.wait [#allocation3], 32  }
 0x15f   :  { %184 = vsyncadd [#allocation3], 4294967264 }
 0x160   :  { %147 = vsyncpa [#allocation3], 1 }

// kernel: _forward.1
= control target key start
LH: loop header
LB: loop body
LE: loop exit
PB: predicated region body
PF: predicated region fallthrough
CT: control target
= control target key end

     0   :  { %vm23_vm0 = vcmask 1043456   ;;  %s228_s0 = inlined_call_operand.vmem [shape: f32[2,4,256], index: 0, kind: input, shape index: {}]   ;;  %s229_s1 = inlined_call_operand.vmem [shape: f32[4,8], index: 1, kind: input, shape index: {}]   ;;  %s230_s2 = inlined_call_operand.vmem [shape: f32[1,8], index: 2, kind: input, shape index: {}]   ;;  %s231_s3 = inlined_call_operand.hbm [shape: f32[2,8], index: 3, kind: output, shape index: {}]  }
   0x1   :  { %v15_v0 = vld [vmem:[%s228_s0] sm:$0xff]  ;;  %v16_v1 = vld [vmem:[%s228_s0 + $0x8] sm:$0xff] }
   0x2   :  { %8 = vsyncpa [#allocation3], 0  ;;  %v19_v2 = vcombine.high %v15_v0, %v15_v0  ;;  %v24_v3 = vsel %vm23_vm0, %v15_v0, 0.0  ;;  %v20_v4 = vcombine.high %v16_v1, %v16_v1  ;;  %v29_v6 = vsel %vm23_vm0, %v16_v1, 0.0  ;;  %v34_v10 = vld [vmem:[%s229_s1] sm:$0xf] }
   0x3   :  { %v185_v11 = vmov 0.0   ;;  %vm186_vm1 = vmmov 0   ;;  %v44_v12 = vlaneseq  ;;  %vm54_vm2 = vcmask 1041409   ;;  %v148_v21 = vld [vmem:[%s230_s2] ss:$0 sm:$0xff]  ;;  %s187_s18 = smov [#allocation2]  }
   0x4   :  { %v25_v5 = vsel %vm23_vm0, %v19_v2, 0.0  ;;  %v30_v7 = vsel %vm23_vm0, %v20_v4, 0.0  ;;  %153 = vmatprep.subr.mxu0 %v185_v11  ;;  %155 = vmatprep.mubr.msk.f32.mxu0 %vm186_vm1, %v185_v11  ;;  %vm56_vm3 = vcmask 31744   ;;  %s140_s19 = sshll.u32 %s187_s18, 4  ;;  %vm132_vm4 = vcmask 58368   ;;  %s141_s19 = int_to_ptr.vmem [resolvable:$true] %s140_s19 }
   0x5   :  { %v26_v8 = vadd.f32 %v25_v5, %v24_v3  ;;  %v31_v9 = vadd.f32 %v30_v7, %v29_v6  ;;  %154 = vmatpush3.msk.msra.mxu0 %vm23_vm0, %v34_v10  ;;  %v45_v13 = vand.u32 127, %v44_v12  ;;  %v47_v14 = vshrl.u32 %v44_v12, 7  ;;  %s163_s20 = scalar_lea.vmem %s141_s19, 32  ;;  %p168_p1 = scmp.lt.s32.totalorder %s141_s19, %s141_s19 }
   0x6   :  { %p164_p0 = scmp.ne.s32.totalorder %s141_s19, %s163_s20  ;;  %p169_p2 = scmp.lt.s32.totalorder %s163_s20, %s163_s20 }
   0x7   :  { %27 = vadd.xlane.f32.xlu0 %v26_v8  ;;  %v48_v16 = vsub.s32 %v45_v13, %v47_v14 }
   0x8   :  { %p170_p3 = por %p169_p2, %p168_p1 }
   0xa   :  { %p171_p4 = pnand %p170_p3, %p164_p0 }
   0xb   :  { %32 = vadd.xlane.f32.xlu0 %v31_v9 }
  0x90   :  { %v28_v15 = vpop.xlane.xlu0 %27 }
  0x91   :  { %v49_v18 = vrot.slane %v28_v15, %v48_v16 }
  0x94   :  { %v33_v17 = vpop.xlane.xlu0 %32 }
  0x95   :  { %v53_v19 = vrot.slane %v33_v17, %v48_v16 }
  0x97   :  { %v55_v20 = vsel %vm54_vm2, %v53_v19, %v49_v18 }
  0x98   :  { %156 = vmatmul.mubr.msk.f32.vlgmr.msra.gmra.mxu0 %vm56_vm3, %v55_v20 }
 0x158   :  { %v128_v22 = vpop.f32.mrf.mxu0 }
 0x159   :  { %v129_v23 = vadd.f32 %v148_v21, %v128_v22 }
 0x15a   :  { %v157_v24 = vpop.f32.mrf.mxu0 }
 0x15b   :  { %133 = vst.msk [vmem:[#allocation2] sm:$0x3] %vm132_vm4, %v129_v23 }
 0x15c   :  { %174 = shalt.err (!%p171_p4)
}
 0x15d   :  { %143 = dma.vmem_to_hbm [thread:$0]  %s141_s19, 32, %s231_s3, [#allocation3]  }
 0x15e   :  { %183 = dma.done.wait [#allocation3], 32  }
 0x15f   :  { %184 = vsyncadd [#allocation3], 4294967264 }
 0x160   :  { %147 = vsyncpa [#allocation3], 1 }

</bundles_post_ra>
